<compile_context>
chip_gen: v7x
topology: tpu7x:2x2x1
jax: 0.10.0
libtpu: 0.0.40
codegen_flags: <defaults>
</compile_context>

<pallas_src>
import functools

import jax
import jax.numpy as jnp
from jax.experimental import pallas as pl
from jax.experimental.pallas import tpu as pltpu

EPS = 1e-5
LANE = 128      # TPU lane width
SUBLANE = 8     # f32 sublane group


def _round_up(x, m):
    return (x + m - 1) // m * m


# ------------------------------ fused kernel -------------------------------- #

def _make_kernel(N, H, W, Cp, Ltot, mxu_dtype):
    """Build the fused residual-block kernel for fixed (N, H, W, Cp, Ltot)."""
    Hp, Wp = H + 2, W + 2
    inv_count = 1.0 / float(N * H * W)
    # flat offset of tap (kh, kw) relative to the output pixel, t = kh*3 + kw
    offs = [dh * Wp + dw for dh in (-1, 0, 1) for dw in (-1, 0, 1)]

    def kernel(xs_ref, m_ref, w1_ref, g1_ref, b1_ref, w2_ref, g2_ref, b2_ref,
               o_ref, stack_ref):
        xs = xs_ref[...]                                    # (Cp, Ltot) f32
        # hoist the mask broadcast once (no CSE of broadcast_in_dim)
        msk = jnp.broadcast_to(m_ref[...], (Cp, Ltot))      # 1.0 at real pixels

        def stack_taps(base):
            # Tap-stacked operand: stack_ref[t*Cp + ci, j] = base[ci, j + off_t].
            # pltpu.roll is circular (XLU); the >=Wp+1-lane zero margins around
            # the frame block keep the valid window wrap-free, and wrap-polluted
            # margin lanes are masked out of BN stats / zeroed before reuse.
            for t, off in enumerate(offs):
                rolled = base if off == 0 else pltpu.roll(
                    base, shift=(-off) % Ltot, axis=1)
                stack_ref[t * Cp:(t + 1) * Cp, :] = rolled

        def conv(w_ref):
            # ONE (Cp, 9*Cp) @ (9*Cp, Ltot) MXU contraction, f32 accumulate.
            return jnp.dot(w_ref[...], stack_ref[...].astype(mxu_dtype),
                           preferred_element_type=jnp.float32)

        def bn(y, gamma, beta):
            # Two-pass training-mode BatchNorm2d (biased variance), masked lanes.
            mean = jnp.sum(y * msk, axis=1, keepdims=True) * inv_count
            d = (y - mean) * msk
            var = jnp.sum(d * d, axis=1, keepdims=True) * inv_count
            return (y - mean) * jax.lax.rsqrt(var + EPS) * gamma + beta

        # ---- stage 1: conv1 -> bn1 -> relu ---------------------------------- #
        stack_taps(xs)
        h1 = bn(conv(w1_ref), g1_ref[...], b1_ref[...])
        # ReLU, then zero halo/margins so conv2 sees true zero padding.
        h1 = jnp.maximum(h1, 0.0) * msk

        # ---- stage 2: conv2 -> bn2 -> +residual -> relu --------------------- #
        stack_taps(h1)
        y2 = bn(conv(w2_ref), g2_ref[...], b2_ref[...])

        # residual add (pre-activation x) + ReLU; halo/margin lanes are
        # discarded by the wrapper, so their values are irrelevant.
        o_ref[...] = jnp.maximum(y2 + xs, 0.0)

    return kernel


# --------------------------------- wrapper ----------------------------------- #

def residual_block_forward(x_nchw, params, *, mxu_dtype=jnp.float32):
    """Forward pass of ResidualBlock.  x_nchw: (N, C, H, W) float32.

    mxu_dtype=jnp.bfloat16 is the fast MXU path on v6e/v7x (f32 accumulation,
    f32 BN/ReLU/residual math); jnp.float32 keeps exact module precision.
    """
    w1, g1, b1, w2, g2, b2 = params
    x = x_nchw.astype(jnp.float32)
    N, C, H, W = x.shape
    Hp, Wp = H + 2, W + 2
    P = Hp * Wp                      # flattened zero-padded frame per image
    L_img = N * P                    # frames block length on the lane axis

    Cp = _round_up(C, SUBLANE)       # fill the f32 sublane group
    margin = Wp + 1                  # max tap reach
    K = _round_up(margin, 64)        # left margin of the frame block
    Ltot = _round_up(K + L_img + margin, LANE)   # 128-aligned slab width

    kernel = _make_kernel(N, H, W, Cp, Ltot, mxu_dtype)

    # ---- layout plumbing: lane-dense (Cp, flattened zero-padded frames) ----- #
    xp = jnp.pad(x, ((0, 0), (0, Cp - C), (0, 0), (0, 0)))        # pad channels
    xp = jnp.pad(xp, ((0, 0), (0, 0), (1, 1), (1, 1)))            # zero halo
    xs = jnp.transpose(xp, (1, 0, 2, 3)).reshape(Cp, L_img)       # (Cp, L_img)
    xs = jnp.pad(xs, ((0, 0), (K, Ltot - K - L_img)))             # (Cp, Ltot)

    m = jnp.pad(jnp.ones((1, N, H, W), jnp.float32),
                ((0, 0), (0, 0), (1, 1), (1, 1)))                 # (1,N,Hp,Wp)
    mw = jnp.pad(m.reshape(1, L_img), ((0, 0), (K, Ltot - K - L_img)))

    def prep_w(w):   # (3,3,Cin,Cout) HWIO -> (Cp, 9*Cp), [co, t*Cp+ci]
        wpad = jnp.pad(w, ((0, 0), (0, 0), (0, Cp - C), (0, Cp - C)))
        return (jnp.transpose(wpad, (3, 0, 1, 2))
                .reshape(Cp, 9 * Cp).astype(mxu_dtype))

    def prep_gamma(g):   # pad channels with gamma=1 (keeps pad channels at 0)
        return jnp.pad(g, (0, Cp - C), constant_values=1.0).reshape(Cp, 1)

    def prep_beta(b):
        return jnp.pad(b, (0, Cp - C)).reshape(Cp, 1)

    vmem = pl.BlockSpec(memory_space=pltpu.MemorySpace.VMEM)
    out = pl.pallas_call(
        kernel,
        out_shape=jax.ShapeDtypeStruct((Cp, Ltot), jnp.float32),
        in_specs=[vmem] * 8,
        out_specs=vmem,
        scratch_shapes=[pltpu.VMEM((9 * Cp, Ltot), jnp.float32)],
        compiler_params=pltpu.CompilerParams(
            vmem_limit_bytes=16 * 1024 * 1024),
    )(xs, mw,
      prep_w(w1), prep_gamma(g1), prep_beta(b1),
      prep_w(w2), prep_gamma(g2), prep_beta(b2))

    # back to NCHW: drop pad channels, margins and the zero halo
    out = out[:C, K:K + L_img].reshape(C, N, Hp, Wp)[:, :, 1:-1, 1:-1]
    return jnp.transpose(out, (1, 0, 2, 3))


# ------------------------------ pure-JAX reference --------------------------- #

def residual_block_ref(x_nchw, params, conv_dtype=jnp.float32):
    w1, g1, b1, w2, g2, b2 = params
    x = jnp.transpose(x_nchw, (0, 2, 3, 1)).astype(jnp.float32)

    def conv(inp, w):
        return jax.lax.conv_general_dilated(
            inp.astype(conv_dtype), w.astype(conv_dtype), (1, 1), "SAME",
            dimension_numbers=("NHWC", "HWIO", "NHWC"),
            preferred_element_type=jnp.float32)

    def bn(y, g, b):
        mean = jnp.mean(y, axis=(0, 1, 2), keepdims=True)
        var = jnp.mean((y - mean) ** 2, axis=(0, 1, 2), keepdims=True)
        return ((y - mean) * jax.lax.rsqrt(var + EPS)
                * g.reshape(1, 1, 1, -1) + b.reshape(1, 1, 1, -1))

    h = jax.nn.relu(bn(conv(x, w1), g1, b1))
    out = jax.nn.relu(bn(conv(h, w2), g2, b2) + x)
    return jnp.transpose(out, (0, 3, 1, 2))


# ----------------------------------- main ------------------------------------ #

if __name__ == "__main__":
    N, C, H, W = 2, 4, 16, 16   # in_channels == out_channels (downsample=None)

    key = jax.random.PRNGKey(0)
    kx, kw1, kw2, kg1, kb1, kg2, kb2 = jax.random.split(key, 7)

    x = jax.random.normal(kx, (N, C, H, W), jnp.float32)
    # conv weights stored HWIO (3, 3, Cin, Cout); equivalent to PyTorch OIHW.
    w1 = 0.1 * jax.random.normal(kw1, (3, 3, C, C), jnp.float32)
    w2 = 0.1 * jax.random.normal(kw2, (3, 3, C, C), jnp.float32)
    # BatchNorm affine params.
    g1 = 1.0 + 0.1 * jax.random.normal(kg1, (C,), jnp.float32)
    b1 = 0.1 * jax.random.normal(kb1, (C,), jnp.float32)
    g2 = 1.0 + 0.1 * jax.random.normal(kg2, (C,), jnp.float32)
    b2 = 0.1 * jax.random.normal(kb2, (C,), jnp.float32)

    params = (w1, g1, b1, w2, g2, b2)

    # ---- f32 MXU path: exact module semantics, tight tolerance ------------- #
    ref = jax.block_until_ready(residual_block_ref(x, params))
    fwd_f32 = jax.jit(functools.partial(residual_block_forward,
                                        mxu_dtype=jnp.float32))
    out = jax.block_until_ready(fwd_f32(x, params))
    assert out.shape == (N, C, H, W), out.shape
    err = float(jnp.max(jnp.abs(out - ref)))
    assert jnp.allclose(out, ref, atol=1e-4, rtol=1e-4), err

    # ---- bf16 MXU path (fast path on v6e/v7x): compare against a bf16-conv
    # reference (both accumulate in f32), so the check stays meaningful ------- #
    ref_bf16 = jax.block_until_ready(
        residual_block_ref(x, params, conv_dtype=jnp.bfloat16))
    fwd_bf16 = jax.jit(functools.partial(residual_block_forward,
                                         mxu_dtype=jnp.bfloat16))
    out_bf16 = jax.block_until_ready(fwd_bf16(x, params))
    err_bf16 = float(jnp.max(jnp.abs(out_bf16 - ref_bf16)))
    assert jnp.allclose(out_bf16, ref_bf16, atol=5e-3, rtol=5e-3), err_bf16

    print("KERNEL_OK")
</pallas_src>

<mosaic_0001>
module attributes {stable_mosaic.version = 11 : i64} {
  func.func @kernel(%arg0: memref<8x768xf32, #tpu.memory_space<vmem>>, %arg1: memref<1x768xf32, #tpu.memory_space<vmem>>, %arg2: memref<8x72xf32, #tpu.memory_space<vmem>>, %arg3: memref<8x1xf32, #tpu.memory_space<vmem>>, %arg4: memref<8x1xf32, #tpu.memory_space<vmem>>, %arg5: memref<8x72xf32, #tpu.memory_space<vmem>>, %arg6: memref<8x1xf32, #tpu.memory_space<vmem>>, %arg7: memref<8x1xf32, #tpu.memory_space<vmem>>, %arg8: memref<8x768xf32, #tpu.memory_space<vmem>>, %arg9: memref<72x768xf32, #tpu.memory_space<vmem>>) attributes {dimension_semantics = [], scalar_prefetch = 0 : i64, scratch_operands = 1 : i64, tpu.core_type = #tpu.core_type<tc>} {
    %c0 = arith.constant 0 : index
    %c0_0 = arith.constant 0 : index
    %0 = vector.load %arg0[%c0, %c0_0] : memref<8x768xf32, #tpu.memory_space<vmem>>, vector<8x768xf32>
    %c0_1 = arith.constant 0 : index
    %c0_2 = arith.constant 0 : index
    %1 = vector.load %arg1[%c0_1, %c0_2] : memref<1x768xf32, #tpu.memory_space<vmem>>, vector<1x768xf32>
    %2 = vector.shape_cast %1 : vector<1x768xf32> to vector<1x768xf32>
    %3 = vector.broadcast %2 : vector<1x768xf32> to vector<8x768xf32>
    %c19_i32 = arith.constant 19 : i32
    %4 = tpu.dynamic_rotate %0 by %c19_i32 dim 1 : vector<8x768xf32>, i32 -> vector<8x768xf32>
    %c0_3 = arith.constant 0 : index
    %c0_4 = arith.constant 0 : index
    %5 = vector.load %arg9[%c0_3, %c0_4] : memref<72x768xf32, #tpu.memory_space<vmem>>, vector<8x768xf32>
    tpu.vector_store %arg9[%c0_3, %c0_4], %4 {strides = array<i32>} : memref<72x768xf32, #tpu.memory_space<vmem>>, vector<8x768xf32>,
    %c18_i32 = arith.constant 18 : i32
    %6 = tpu.dynamic_rotate %0 by %c18_i32 dim 1 : vector<8x768xf32>, i32 -> vector<8x768xf32>
    %c8 = arith.constant 8 : index
    %c0_5 = arith.constant 0 : index
    %7 = vector.load %arg9[%c8, %c0_5] : memref<72x768xf32, #tpu.memory_space<vmem>>, vector<8x768xf32>
    tpu.vector_store %arg9[%c8, %c0_5], %6 {strides = array<i32>} : memref<72x768xf32, #tpu.memory_space<vmem>>, vector<8x768xf32>,
    %c17_i32 = arith.constant 17 : i32
    %8 = tpu.dynamic_rotate %0 by %c17_i32 dim 1 : vector<8x768xf32>, i32 -> vector<8x768xf32>
    %c16 = arith.constant 16 : index
    %c0_6 = arith.constant 0 : index
    %9 = vector.load %arg9[%c16, %c0_6] : memref<72x768xf32, #tpu.memory_space<vmem>>, vector<8x768xf32>
    tpu.vector_store %arg9[%c16, %c0_6], %8 {strides = array<i32>} : memref<72x768xf32, #tpu.memory_space<vmem>>, vector<8x768xf32>,
    %c1_i32 = arith.constant 1 : i32
    %10 = tpu.dynamic_rotate %0 by %c1_i32 dim 1 : vector<8x768xf32>, i32 -> vector<8x768xf32>
    %c24 = arith.constant 24 : index
    %c0_7 = arith.constant 0 : index
    %11 = vector.load %arg9[%c24, %c0_7] : memref<72x768xf32, #tpu.memory_space<vmem>>, vector<8x768xf32>
    tpu.vector_store %arg9[%c24, %c0_7], %10 {strides = array<i32>} : memref<72x768xf32, #tpu.memory_space<vmem>>, vector<8x768xf32>,
    %c32 = arith.constant 32 : index
    %c0_8 = arith.constant 0 : index
    %12 = vector.load %arg9[%c32, %c0_8] : memref<72x768xf32, #tpu.memory_space<vmem>>, vector<8x768xf32>
    tpu.vector_store %arg9[%c32, %c0_8], %0 {strides = array<i32>} : memref<72x768xf32, #tpu.memory_space<vmem>>, vector<8x768xf32>,
    %c767_i32 = arith.constant 767 : i32
    %13 = tpu.dynamic_rotate %0 by %c767_i32 dim 1 : vector<8x768xf32>, i32 -> vector<8x768xf32>
    %c40 = arith.constant 40 : index
    %c0_9 = arith.constant 0 : index
    %14 = vector.load %arg9[%c40, %c0_9] : memref<72x768xf32, #tpu.memory_space<vmem>>, vector<8x768xf32>
    tpu.vector_store %arg9[%c40, %c0_9], %13 {strides = array<i32>} : memref<72x768xf32, #tpu.memory_space<vmem>>, vector<8x768xf32>,
    %c751_i32 = arith.constant 751 : i32
    %15 = tpu.dynamic_rotate %0 by %c751_i32 dim 1 : vector<8x768xf32>, i32 -> vector<8x768xf32>
    %c48 = arith.constant 48 : index
    %c0_10 = arith.constant 0 : index
    %16 = vector.load %arg9[%c48, %c0_10] : memref<72x768xf32, #tpu.memory_space<vmem>>, vector<8x768xf32>
    tpu.vector_store %arg9[%c48, %c0_10], %15 {strides = array<i32>} : memref<72x768xf32, #tpu.memory_space<vmem>>, vector<8x768xf32>,
    %c750_i32 = arith.constant 750 : i32
    %17 = tpu.dynamic_rotate %0 by %c750_i32 dim 1 : vector<8x768xf32>, i32 -> vector<8x768xf32>
    %c56 = arith.constant 56 : index
    %c0_11 = arith.constant 0 : index
    %18 = vector.load %arg9[%c56, %c0_11] : memref<72x768xf32, #tpu.memory_space<vmem>>, vector<8x768xf32>
    tpu.vector_store %arg9[%c56, %c0_11], %17 {strides = array<i32>} : memref<72x768xf32, #tpu.memory_space<vmem>>, vector<8x768xf32>,
    %c749_i32 = arith.constant 749 : i32
    %19 = tpu.dynamic_rotate %0 by %c749_i32 dim 1 : vector<8x768xf32>, i32 -> vector<8x768xf32>
    %c64 = arith.constant 64 : index
    %c0_12 = arith.constant 0 : index
    %20 = vector.load %arg9[%c64, %c0_12] : memref<72x768xf32, #tpu.memory_space<vmem>>, vector<8x768xf32>
    tpu.vector_store %arg9[%c64, %c0_12], %19 {strides = array<i32>} : memref<72x768xf32, #tpu.memory_space<vmem>>, vector<8x768xf32>,
    %c0_13 = arith.constant 0 : index
    %c0_14 = arith.constant 0 : index
    %21 = vector.load %arg2[%c0_13, %c0_14] : memref<8x72xf32, #tpu.memory_space<vmem>>, vector<8x72xf32>
    %c0_15 = arith.constant 0 : index
    %c0_16 = arith.constant 0 : index
    %22 = vector.load %arg9[%c0_15, %c0_16] : memref<72x768xf32, #tpu.memory_space<vmem>>, vector<72x768xf32>
    %cst = arith.constant dense<0.000000e+00> : vector<8x768xf32>
    %23 = tpu.matmul %21, %22, %cst {dimension_numbers = #tpu.dot_dimension_numbers<[1], [0], [0], [1], [0, 0, 1, 1], [], []>} : vector<8x72xf32>, vector<72x768xf32>, vector<8x768xf32> -> vector<8x768xf32>
    %c0_17 = arith.constant 0 : index
    %c0_18 = arith.constant 0 : index
    %24 = vector.load %arg3[%c0_17, %c0_18] : memref<8x1xf32, #tpu.memory_space<vmem>>, vector<8x1xf32>
    %c0_19 = arith.constant 0 : index
    %c0_20 = arith.constant 0 : index
    %25 = vector.load %arg4[%c0_19, %c0_20] : memref<8x1xf32, #tpu.memory_space<vmem>>, vector<8x1xf32>
    %26 = arith.mulf %23, %3 : vector<8x768xf32>
    %cst_21 = arith.constant dense<0.000000e+00> : vector<8xf32>
    %27 = vector.multi_reduction <add>, %26, %cst_21 [1] : vector<8x768xf32> to vector<8xf32>
    %28 = vector.shape_cast %27 : vector<8xf32> to vector<8x1xf32>
    %cst_22 = arith.constant 0.001953125 : f32
    %29 = vector.broadcast %cst_22 : f32 to vector<8x1xf32>
    %30 = arith.mulf %28, %29 : vector<8x1xf32>
    %31 = vector.broadcast %30 : vector<8x1xf32> to vector<8x768xf32>
    %32 = arith.subf %23, %31 : vector<8x768xf32>
    %33 = arith.mulf %32, %3 : vector<8x768xf32>
    %34 = arith.mulf %33, %33 : vector<8x768xf32>
    %cst_23 = arith.constant dense<0.000000e+00> : vector<8xf32>
    %35 = vector.multi_reduction <add>, %34, %cst_23 [1] : vector<8x768xf32> to vector<8xf32>
    %36 = vector.shape_cast %35 : vector<8xf32> to vector<8x1xf32>
    %cst_24 = arith.constant 0.001953125 : f32
    %37 = vector.broadcast %cst_24 : f32 to vector<8x1xf32>
    %38 = arith.mulf %36, %37 : vector<8x1xf32>
    %39 = vector.broadcast %30 : vector<8x1xf32> to vector<8x768xf32>
    %40 = arith.subf %23, %39 : vector<8x768xf32>
    %cst_25 = arith.constant 9.99999974E-6 : f32
    %41 = vector.broadcast %cst_25 : f32 to vector<8x1xf32>
    %42 = arith.addf %38, %41 : vector<8x1xf32>
    %43 = math.rsqrt %42 : vector<8x1xf32>
    %44 = vector.broadcast %43 : vector<8x1xf32> to vector<8x768xf32>
    %45 = arith.mulf %40, %44 : vector<8x768xf32>
    %46 = vector.broadcast %24 : vector<8x1xf32> to vector<8x768xf32>
    %47 = arith.mulf %45, %46 : vector<8x768xf32>
    %48 = vector.broadcast %25 : vector<8x1xf32> to vector<8x768xf32>
    %49 = arith.addf %47, %48 : vector<8x768xf32>
    %cst_26 = arith.constant 0.000000e+00 : f32
    %50 = vector.broadcast %cst_26 : f32 to vector<8x768xf32>
    %51 = arith.maximumf %49, %50 : vector<8x768xf32>
    %52 = arith.mulf %51, %3 : vector<8x768xf32>
    %c19_i32_27 = arith.constant 19 : i32
    %53 = tpu.dynamic_rotate %52 by %c19_i32_27 dim 1 : vector<8x768xf32>, i32 -> vector<8x768xf32>
    %c0_28 = arith.constant 0 : index
    %c0_29 = arith.constant 0 : index
    %54 = vector.load %arg9[%c0_28, %c0_29] : memref<72x768xf32, #tpu.memory_space<vmem>>, vector<8x768xf32>
    tpu.vector_store %arg9[%c0_28, %c0_29], %53 {strides = array<i32>} : memref<72x768xf32, #tpu.memory_space<vmem>>, vector<8x768xf32>,
    %c18_i32_30 = arith.constant 18 : i32
    %55 = tpu.dynamic_rotate %52 by %c18_i32_30 dim 1 : vector<8x768xf32>, i32 -> vector<8x768xf32>
    %c8_31 = arith.constant 8 : index
    %c0_32 = arith.constant 0 : index
    %56 = vector.load %arg9[%c8_31, %c0_32] : memref<72x768xf32, #tpu.memory_space<vmem>>, vector<8x768xf32>
    tpu.vector_store %arg9[%c8_31, %c0_32], %55 {strides = array<i32>} : memref<72x768xf32, #tpu.memory_space<vmem>>, vector<8x768xf32>,
    %c17_i32_33 = arith.constant 17 : i32
    %57 = tpu.dynamic_rotate %52 by %c17_i32_33 dim 1 : vector<8x768xf32>, i32 -> vector<8x768xf32>
    %c16_34 = arith.constant 16 : index
    %c0_35 = arith.constant 0 : index
    %58 = vector.load %arg9[%c16_34, %c0_35] : memref<72x768xf32, #tpu.memory_space<vmem>>, vector<8x768xf32>
    tpu.vector_store %arg9[%c16_34, %c0_35], %57 {strides = array<i32>} : memref<72x768xf32, #tpu.memory_space<vmem>>, vector<8x768xf32>,
    %c1_i32_36 = arith.constant 1 : i32
    %59 = tpu.dynamic_rotate %52 by %c1_i32_36 dim 1 : vector<8x768xf32>, i32 -> vector<8x768xf32>
    %c24_37 = arith.constant 24 : index
    %c0_38 = arith.constant 0 : index
    %60 = vector.load %arg9[%c24_37, %c0_38] : memref<72x768xf32, #tpu.memory_space<vmem>>, vector<8x768xf32>
    tpu.vector_store %arg9[%c24_37, %c0_38], %59 {strides = array<i32>} : memref<72x768xf32, #tpu.memory_space<vmem>>, vector<8x768xf32>,
    %c32_39 = arith.constant 32 : index
    %c0_40 = arith.constant 0 : index
    %61 = vector.load %arg9[%c32_39, %c0_40] : memref<72x768xf32, #tpu.memory_space<vmem>>, vector<8x768xf32>
    tpu.vector_store %arg9[%c32_39, %c0_40], %52 {strides = array<i32>} : memref<72x768xf32, #tpu.memory_space<vmem>>, vector<8x768xf32>,
    %c767_i32_41 = arith.constant 767 : i32
    %62 = tpu.dynamic_rotate %52 by %c767_i32_41 dim 1 : vector<8x768xf32>, i32 -> vector<8x768xf32>
    %c40_42 = arith.constant 40 : index
    %c0_43 = arith.constant 0 : index
    %63 = vector.load %arg9[%c40_42, %c0_43] : memref<72x768xf32, #tpu.memory_space<vmem>>, vector<8x768xf32>
    tpu.vector_store %arg9[%c40_42, %c0_43], %62 {strides = array<i32>} : memref<72x768xf32, #tpu.memory_space<vmem>>, vector<8x768xf32>,
    %c751_i32_44 = arith.constant 751 : i32
    %64 = tpu.dynamic_rotate %52 by %c751_i32_44 dim 1 : vector<8x768xf32>, i32 -> vector<8x768xf32>
    %c48_45 = arith.constant 48 : index
    %c0_46 = arith.constant 0 : index
    %65 = vector.load %arg9[%c48_45, %c0_46] : memref<72x768xf32, #tpu.memory_space<vmem>>, vector<8x768xf32>
    tpu.vector_store %arg9[%c48_45, %c0_46], %64 {strides = array<i32>} : memref<72x768xf32, #tpu.memory_space<vmem>>, vector<8x768xf32>,
    %c750_i32_47 = arith.constant 750 : i32
    %66 = tpu.dynamic_rotate %52 by %c750_i32_47 dim 1 : vector<8x768xf32>, i32 -> vector<8x768xf32>
    %c56_48 = arith.constant 56 : index
    %c0_49 = arith.constant 0 : index
    %67 = vector.load %arg9[%c56_48, %c0_49] : memref<72x768xf32, #tpu.memory_space<vmem>>, vector<8x768xf32>
    tpu.vector_store %arg9[%c56_48, %c0_49], %66 {strides = array<i32>} : memref<72x768xf32, #tpu.memory_space<vmem>>, vector<8x768xf32>,
    %c749_i32_50 = arith.constant 749 : i32
    %68 = tpu.dynamic_rotate %52 by %c749_i32_50 dim 1 : vector<8x768xf32>, i32 -> vector<8x768xf32>
    %c64_51 = arith.constant 64 : index
    %c0_52 = arith.constant 0 : index
    %69 = vector.load %arg9[%c64_51, %c0_52] : memref<72x768xf32, #tpu.memory_space<vmem>>, vector<8x768xf32>
    tpu.vector_store %arg9[%c64_51, %c0_52], %68 {strides = array<i32>} : memref<72x768xf32, #tpu.memory_space<vmem>>, vector<8x768xf32>,
    %c0_53 = arith.constant 0 : index
    %c0_54 = arith.constant 0 : index
    %70 = vector.load %arg5[%c0_53, %c0_54] : memref<8x72xf32, #tpu.memory_space<vmem>>, vector<8x72xf32>
    %c0_55 = arith.constant 0 : index
    %c0_56 = arith.constant 0 : index
    %71 = vector.load %arg9[%c0_55, %c0_56] : memref<72x768xf32, #tpu.memory_space<vmem>>, vector<72x768xf32>
    %cst_57 = arith.constant dense<0.000000e+00> : vector<8x768xf32>
    %72 = tpu.matmul %70, %71, %cst_57 {dimension_numbers = #tpu.dot_dimension_numbers<[1], [0], [0], [1], [0, 0, 1, 1], [], []>} : vector<8x72xf32>, vector<72x768xf32>, vector<8x768xf32> -> vector<8x768xf32>
    %c0_58 = arith.constant 0 : index
    %c0_59 = arith.constant 0 : index
    %73 = vector.load %arg6[%c0_58, %c0_59] : memref<8x1xf32, #tpu.memory_space<vmem>>, vector<8x1xf32>
    %c0_60 = arith.constant 0 : index
    %c0_61 = arith.constant 0 : index
    %74 = vector.load %arg7[%c0_60, %c0_61] : memref<8x1xf32, #tpu.memory_space<vmem>>, vector<8x1xf32>
    %75 = arith.mulf %72, %3 : vector<8x768xf32>
    %cst_62 = arith.constant dense<0.000000e+00> : vector<8xf32>
    %76 = vector.multi_reduction <add>, %75, %cst_62 [1] : vector<8x768xf32> to vector<8xf32>
    %77 = vector.shape_cast %76 : vector<8xf32> to vector<8x1xf32>
    %cst_63 = arith.constant 0.001953125 : f32
    %78 = vector.broadcast %cst_63 : f32 to vector<8x1xf32>
    %79 = arith.mulf %77, %78 : vector<8x1xf32>
    %80 = vector.broadcast %79 : vector<8x1xf32> to vector<8x768xf32>
    %81 = arith.subf %72, %80 : vector<8x768xf32>
    %82 = arith.mulf %81, %3 : vector<8x768xf32>
    %83 = arith.mulf %82, %82 : vector<8x768xf32>
    %cst_64 = arith.constant dense<0.000000e+00> : vector<8xf32>
    %84 = vector.multi_reduction <add>, %83, %cst_64 [1] : vector<8x768xf32> to vector<8xf32>
    %85 = vector.shape_cast %84 : vector<8xf32> to vector<8x1xf32>
    %cst_65 = arith.constant 0.001953125 : f32
    %86 = vector.broadcast %cst_65 : f32 to vector<8x1xf32>
    %87 = arith.mulf %85, %86 : vector<8x1xf32>
    %88 = vector.broadcast %79 : vector<8x1xf32> to vector<8x768xf32>
    %89 = arith.subf %72, %88 : vector<8x768xf32>
    %cst_66 = arith.constant 9.99999974E-6 : f32
    %90 = vector.broadcast %cst_66 : f32 to vector<8x1xf32>
    %91 = arith.addf %87, %90 : vector<8x1xf32>
    %92 = math.rsqrt %91 : vector<8x1xf32>
    %93 = vector.broadcast %92 : vector<8x1xf32> to vector<8x768xf32>
    %94 = arith.mulf %89, %93 : vector<8x768xf32>
    %95 = vector.broadcast %73 : vector<8x1xf32> to vector<8x768xf32>
    %96 = arith.mulf %94, %95 : vector<8x768xf32>
    %97 = vector.broadcast %74 : vector<8x1xf32> to vector<8x768xf32>
    %98 = arith.addf %96, %97 : vector<8x768xf32>
    %99 = arith.addf %98, %0 : vector<8x768xf32>
    %cst_67 = arith.constant 0.000000e+00 : f32
    %100 = vector.broadcast %cst_67 : f32 to vector<8x768xf32>
    %101 = arith.maximumf %99, %100 : vector<8x768xf32>
    %c0_68 = arith.constant 0 : index
    %c0_69 = arith.constant 0 : index
    %102 = vector.load %arg8[%c0_68, %c0_69] : memref<8x768xf32, #tpu.memory_space<vmem>>, vector<8x768xf32>
    tpu.vector_store %arg8[%c0_68, %c0_69], %101 {strides = array<i32>} : memref<8x768xf32, #tpu.memory_space<vmem>>, vector<8x768xf32>,
    return
  }
}

</mosaic_0001>

<bundles_post_ra>
// kernel: residual_block_forward.1
= control target key start
LH: loop header
LB: loop body
LE: loop exit
PB: predicated region body
PF: predicated region fallthrough
CT: control target
= control target key end

     0   :  { %s1498_s13 = smov 19   ;;  %s1499_s14 = smov 18   ;;  %v1505_v10 = vmov 0.0   ;;  %v37_v11 = vlaneseq  ;;  %vm330_vm8 = vcmask 588800   ;;  %s2248_s0 = inlined_call_operand.vmem [shape: f32[8,768], index: 0, kind: input, shape index: {}]   ;;  %s2249_s2 = inlined_call_operand.vmem [shape: f32[8,72], index: 2, kind: input, shape index: {}]   ;;  %s2250_s1 = inlined_call_operand.vmem [shape: f32[1,768], index: 1, kind: input, shape index: {}]   ;;  %s2251_s3 = inlined_call_operand.vmem [shape: f32[8,1], index: 3, kind: input, shape index: {}]   ;;  %s2252_s4 = inlined_call_operand.vmem [shape: f32[8,1], index: 4, kind: input, shape index: {}]   ;;  %s2253_s5 = inlined_call_operand.vmem [shape: f32[8,72], index: 5, kind: input, shape index: {}]   ;;  %s2254_s6 = inlined_call_operand.vmem [shape: f32[8,1], index: 6, kind: input, shape index: {}]   ;;  %s2255_s7 = inlined_call_operand.vmem [shape: f32[8,1], index: 7, kind: input, shape index: {}]   ;;  %s2256_s8 = inlined_call_operand.vmem [shape: f32[8,768], index: 8, kind: output, shape index: {}]  }
   0x1   :  { %v1556_v0 = vld [vmem:[%s2248_s0 + $0x10] sm:$0xff]  ;;  %v1561_v1 = vld [vmem:[%s2248_s0 + $0x28] sm:$0xff]  ;;  %v1566_v2 = vld [vmem:[%s2248_s0] sm:$0xff]  ;;  %s1500_s15 = smov 1   ;;  %s1501_s16 = smov 17   ;;  %398 = vmatprep.mubr.f32.mxu0 %v1505_v10  ;;  %469 = vmatprep.mubr.f32.mxu1 %v1505_v10 }
   0x2   :  { %v1316_v3 = vpack.i.bf16 %v1556_v0, %v1561_v1  ;;  %v1573_v4 = vld [vmem:[%s2248_s0 + $0x8] sm:$0xff]  ;;  %s1502_s17 = smov 127   ;;  %s1503_s18 = smov 110   ;;  %v1595_v7 = vld [vmem:[%s2248_s0 + $0x18] sm:$0xff]  ;;  %v1600_v8 = vld [vmem:[%s2248_s0 + $0x20] sm:$0xff]  ;;  %v1640_v14 = vand.u32 127, %v37_v11 }
   0x3   :  { %v1306_v5 = vpack.i.bf16 %v1573_v4, %v1566_v2  ;;  %v1346_v6 = vpack.i.bf16 %v1556_v0, %v1573_v4  ;;  %s1504_s19 = smov 111   ;;  %v1366_v9 = vpack.i.bf16 %v1600_v8, %v1595_v7  ;;  %s1506_s24 = smov 109  }
   0x4   :  { %1317 = vrot.lane.b32.xlu1 %v1316_v3, %s1498_s13  ;;  %vm81_vm0 = vcmp.lt.s32.totalorder %v1640_v14, 19  ;;  %vm106_vm1 = vcmp.lt.s32.totalorder %v1640_v14, 18  ;;  %vm131_vm2 = vcmp.lt.s32.totalorder %v1640_v14, 17  ;;  %vm156_vm3 = vcmp.lt.s32.totalorder %v1640_v14, 1 }
   0x5   :  { %1307 = vrot.lane.b32.xlu0 %v1306_v5, %s1498_s13  ;;  %vm187_vm4 = vcmp.lt.s32.totalorder %v1640_v14, 127  ;;  %vm237_vm5 = vcmp.lt.s32.totalorder %v1640_v14, 110  ;;  %vm212_vm6 = vcmp.lt.s32.totalorder %v1640_v14, 111  ;;  %vm262_vm7 = vcmp.lt.s32.totalorder %v1640_v14, 109 }
   0x8   :  { %1322 = vrot.lane.b32.xlu1 %v1316_v3, %s1499_s14 }
   0x9   :  { %1312 = vrot.lane.b32.xlu0 %v1306_v5, %s1499_s14 }
   0xc   :  { %1332 = vrot.lane.b32.xlu1 %v1306_v5, %s1500_s15 }
   0xd   :  { %1327 = vrot.lane.b32.xlu0 %v1306_v5, %s1501_s16 }
  0x10   :  { %1342 = vrot.lane.b32.xlu1 %v1316_v3, %s1500_s15 }
  0x11   :  { %1337 = vrot.lane.b32.xlu0 %v1316_v3, %s1501_s16 }
  0x14   :  { %175 = vrot.lane.b32.xlu1 %v1566_v2, %s1502_s17 }
  0x15   :  { %1347 = vrot.lane.b32.xlu0 %v1346_v6, %s1502_s17 }
  0x18   :  { %1357 = vrot.lane.b32.xlu1 %v1346_v6, %s1503_s18 }
  0x19   :  { %1352 = vrot.lane.b32.xlu0 %v1346_v6, %s1504_s19 }
  0x1c   :  { %225 = vrot.lane.b32.xlu1 %v1566_v2, %s1503_s18 }
  0x1d   :  { %200 = vrot.lane.b32.xlu0 %v1566_v2, %s1504_s19 }
  0x20   :  { %1367 = vrot.lane.b32.xlu1 %v1366_v9, %s1499_s14 }
  0x21   :  { %1362 = vrot.lane.b32.xlu0 %v1366_v9, %s1498_s13 }
  0x24   :  { %1377 = vrot.lane.b32.xlu1 %v1366_v9, %s1500_s15 }
  0x25   :  { %1372 = vrot.lane.b32.xlu0 %v1366_v9, %s1501_s16 }
  0x28   :  { %254 = vrot.lane.b32.xlu1 %v1556_v0, %s1506_s24 }
  0x29   :  { %252 = vrot.lane.b32.xlu0 %v1573_v4, %s1506_s24 }
  0x2c   :  { %1382 = vrot.lane.b32.xlu1 %v1366_v9, %s1502_s17 }
  0x2d   :  { %250 = vrot.lane.b32.xlu0 %v1566_v2, %s1506_s24 }
  0x30   :  { %1387 = vrot.lane.b32.xlu1 %v1366_v9, %s1504_s19 }
  0x31   :  { %185 = vrot.lane.b32.xlu0 %v1561_v1, %s1502_s17 }
  0x34   :  { %210 = vrot.lane.b32.xlu1 %v1561_v1, %s1504_s19 }
  0x35   :  { %1392 = vrot.lane.b32.xlu0 %v1366_v9, %s1503_s18 }
  0x38   :  { %256 = vrot.lane.b32.xlu1 %v1595_v7, %s1506_s24 }
  0x39   :  { %235 = vrot.lane.b32.xlu0 %v1561_v1, %s1503_s18 }
  0x3c   :  { %260 = vrot.lane.b32.xlu1 %v1561_v1, %s1506_s24 }
  0x3d   :  { %258 = vrot.lane.b32.xlu0 %v1600_v8, %s1506_s24 }
  0x76   :  { %v1635_v12 = vpop.permute.xlu1 %1317 }
  0x77   :  { %v1637_v13 = vpop.permute.xlu0 %1307  ;;  %v1319_v15 = vunpack.i.l.bf16 %v1635_v12  ;;  %v1320_v9 = vunpack.i.h.bf16 %v1635_v12 }
  0x78   :  { %v1310_v16 = vunpack.i.h.bf16 %v1637_v13  ;;  %v1309_v17 = vunpack.i.l.bf16 %v1637_v13 }
  0x7a   :  { %v1645_v18 = vpop.permute.xlu1 %1322  ;;  %v86_v24 = vsel %vm81_vm0, %v1309_v17, %v1310_v16  ;;  %v87_v26 = vsel %vm81_vm0, %v1319_v15, %v1309_v17 }
  0x7b   :  { %v1324_v19 = vunpack.i.l.bf16 %v1645_v18  ;;  %v1648_v20 = vpop.permute.xlu0 %1312 }
  0x7c   :  { %v1315_v21 = vunpack.i.h.bf16 %v1648_v20  ;;  %v1314_v22 = vunpack.i.l.bf16 %v1648_v20 }
  0x7e   :  { %v1656_v23 = vpop.permute.xlu1 %1332  ;;  %v111_v25 = vsel %vm106_vm1, %v1314_v22, %v1315_v21  ;;  %v112_v27 = vsel %vm106_vm1, %v1324_v19, %v1314_v22 }
  0x7f   :  { %v1335_v28 = vunpack.i.h.bf16 %v1656_v23  ;;  %v1334_v29 = vunpack.i.l.bf16 %v1656_v23  ;;  %v1676_v30 = vpop.permute.xlu0 %1327  ;;  %v1200_v31 = vpack.c.bf16 %v111_v25, %v86_v24  ;;  %v1202_v32 = vpack.c.bf16 %v112_v27, %v87_v26 }
  0x80   :  { %v1330_v33 = vunpack.i.h.bf16 %v1676_v30  ;;  %v1329_v34 = vunpack.i.l.bf16 %v1676_v30 }
  0x81   :  { %1201 = vmatprep.subr.bf16.mxu0 %v1200_v31  ;;  %v161_v35 = vsel %vm156_vm3, %v1334_v29, %v1335_v28 }
  0x82   :  { %1203 = vmatpush1.bf16.msra.mxu0 %v1202_v32  ;;  %v1684_v36 = vpop.permute.xlu1 %1342  ;;  %v136_v37 = vsel %vm131_vm2, %v1329_v34, %v1330_v33 }
  0x83   :  { %v1344_v38 = vunpack.i.l.bf16 %v1684_v36  ;;  %v1691_v39 = vpop.permute.xlu0 %1337  ;;  %v1204_v40 = vpack.c.bf16 %v161_v35, %v136_v37  ;;  %v1345_v25 = vunpack.i.h.bf16 %v1684_v36 }
  0x84   :  { %v1339_v41 = vunpack.i.l.bf16 %v1691_v39  ;;  %v1340_v26 = vunpack.i.h.bf16 %v1691_v39 }
  0x85   :  { %1205 = vmatprep.subr.bf16.mxu0 %v1204_v40  ;;  %v162_v42 = vsel %vm156_vm3, %v1344_v38, %v1334_v29  ;;  %v85_v40 = vsel %vm81_vm0, %v1310_v16, %v1320_v9  ;;  %v160_v13 = vsel %vm156_vm3, %v1335_v28, %v1345_v25 }
  0x86   :  { %v1698_v43 = vpop.permute.xlu1 %175  ;;  %v137_v44 = vsel %vm131_vm2, %v1339_v41, %v1329_v34 }
  0x87   :  { %v1704_v45 = vpop.permute.xlu0 %1347  ;;  %v1206_v46 = vpack.c.bf16 %v162_v42, %v137_v44 }
  0x88   :  { %v1350_v47 = vunpack.i.h.bf16 %v1704_v45  ;;  %v1349_v48 = vunpack.i.l.bf16 %v1704_v45 }
  0x89   :  { %1207 = vmatpush1.bf16.msra.mxu0 %v1206_v46 }
  0x8a   :  { %v1709_v49 = vpop.permute.xlu1 %1357  ;;  %v191_v50 = vsel %vm187_vm4, %v1349_v48, %v1350_v47  ;;  %v192_v51 = vsel %vm187_vm4, %v1698_v43, %v1349_v48  ;;  %v135_v48 = vsel %vm131_vm2, %v1330_v33, %v1340_v26 }
  0x8b   :  { %v1360_v52 = vunpack.i.h.bf16 %v1709_v49  ;;  %v1359_v53 = vunpack.i.l.bf16 %v1709_v49  ;;  %v1722_v54 = vpop.permute.xlu0 %1352  ;;  %v1208_v55 = vpack.c.bf16 %v191_v50, %v1573_v4  ;;  %v1210_v56 = vpack.c.bf16 %v192_v51, %v1566_v2 }
  0x8c   :  { %v1355_v57 = vunpack.i.h.bf16 %v1722_v54  ;;  %v1354_v58 = vunpack.i.l.bf16 %v1722_v54  ;;  %v1325_v4 = vunpack.i.h.bf16 %v1645_v18  ;;  %v1222_v33 = vpack.c.bf16 %v160_v13, %v135_v48 }
  0x8d   :  { %1209 = vmatprep.subr.bf16.mxu0 %v1208_v55  ;;  %v241_v59 = vsel %vm237_vm5, %v1359_v53, %v1360_v52 }
  0x8e   :  { %1211 = vmatpush1.bf16.msra.mxu0 %v1210_v56  ;;  %v1732_v60 = vpop.permute.xlu1 %225  ;;  %v216_v61 = vsel %vm212_vm6, %v1354_v58, %v1355_v57  ;;  %v110_v29 = vsel %vm106_vm1, %v1315_v21, %v1325_v4 }
  0x8f   :  { %v242_v62 = vsel %vm237_vm5, %v1732_v60, %v1359_v53  ;;  %v1741_v63 = vpop.permute.xlu0 %200  ;;  %v1212_v2 = vpack.c.bf16 %v241_v59, %v216_v61  ;;  %v1218_v46 = vpack.c.bf16 %v110_v29, %v85_v40 }
  0x90   :  { %v217_v3 = vsel %vm212_vm6, %v1741_v63, %v1354_v58 }
  0x91   :  { %v1214_v5 = vpack.c.bf16 %v242_v62, %v217_v3  ;;  %1213 = vmatprep.subr.bf16.mxu0 %v1212_v2 }
  0x92   :  { %v1368_v6 = vpop.permute.xlu1 %1367 }
  0x93   :  { %v1369_v17 = vunpack.i.l.bf16 %v1368_v6  ;;  %v1363_v22 = vpop.permute.xlu0 %1362  ;;  %1215 = vmatpush1.bf16.msra.mxu0 %v1214_v5  ;;  %v1370_v42 = vunpack.i.h.bf16 %v1368_v6 }
  0x94   :  { %v1364_v24 = vunpack.i.l.bf16 %v1363_v22  ;;  %v1365_v20 = vunpack.i.h.bf16 %v1363_v22 }
  0x95   :  { %v109_v27 = vsel %vm106_vm1, %v1325_v4, %v1369_v17  ;;  %v108_v30 = vsel %vm106_vm1, %v1369_v17, %v1370_v42  ;;  %v107_v59 = vsel %vm106_vm1, %v1370_v42, %v1324_v19  ;;  %v1795_v4 = vld [vmem:[%s2249_s2] sm:$0xff] }
  0x96   :  { %v1378_v31 = vpop.permute.xlu1 %1377  ;;  %v84_v32 = vsel %vm81_vm0, %v1320_v9, %v1364_v24  ;;  %v83_v28 = vsel %vm81_vm0, %v1364_v24, %v1365_v20  ;;  %v82_v58 = vsel %vm81_vm0, %v1365_v20, %v1319_v15 }
  0x97   :  { %v1379_v34 = vunpack.i.l.bf16 %v1378_v31  ;;  %v1373_v35 = vpop.permute.xlu0 %1372  ;;  %v1216_v37 = vpack.c.bf16 %v109_v27, %v84_v32  ;;  %v1380_v51 = vunpack.i.h.bf16 %v1378_v31  ;;  %v1234_v18 = vpack.c.bf16 %v108_v30, %v83_v28 }
  0x98   :  { %v1374_v44 = vunpack.i.l.bf16 %v1373_v35  ;;  %v1375_v53 = vunpack.i.h.bf16 %v1373_v35  ;;  %v1232_v5 = vpack.c.bf16 %v107_v59, %v82_v58 }
  0x99   :  { %1217 = vmatprep.subr.bf16.mxu1 %v1216_v37  ;;  %v159_v21 = vsel %vm156_vm3, %v1345_v25, %v1379_v34  ;;  %v157_v15 = vsel %vm156_vm3, %v1380_v51, %v1344_v38  ;;  %v158_v6 = vsel %vm156_vm3, %v1379_v34, %v1380_v51  ;;  %v38_v51 = vshrl.u32 %v37_v11, 7 }
  0x9a   :  { %1219 = vmatpush1.bf16.msra.mxu1 %v1218_v46  ;;  %v1773_v16 = vpop.permute.xlu1 %254  ;;  %v134_v50 = vsel %vm131_vm2, %v1340_v26, %v1374_v44  ;;  %v132_v12 = vsel %vm131_vm2, %v1375_v53, %v1339_v41  ;;  %v133_v9 = vsel %vm131_vm2, %v1374_v44, %v1375_v53 }
  0x9b   :  { %v253_v55 = vpop.permute.xlu0 %252  ;;  %v1220_v56 = vpack.c.bf16 %v159_v21, %v134_v50  ;;  %v1236_v41 = vpack.c.bf16 %v157_v15, %v132_v12  ;;  %v39_v53 = vsub.s32 0, %v38_v51  ;;  %v55_v11 = vsub.s32 4, %v38_v51 }
  0x9c   :  { %v266_v23 = vsel %vm262_vm7, %v253_v55, %v1773_v16  ;;  %v59_v12 = vsub.s32 5, %v38_v51 }
  0x9d   :  { %350 = vmatprep.subr.mxu0 %v266_v23  ;;  %1221 = vmatprep.subr.bf16.mxu1 %v1220_v56 }
  0x9e   :  { %1223 = vmatpush1.bf16.msra.mxu1 %v1222_v33  ;;  %v1383_v61 = vpop.permute.xlu1 %1382 }
  0x9f   :  { %v1385_v62 = vunpack.i.h.bf16 %v1383_v61  ;;  %v1384_v2 = vunpack.i.l.bf16 %v1383_v61  ;;  %v251_v3 = vpop.permute.xlu0 %250  ;;  %v47_v61 = vsub.s32 2, %v38_v51 }
  0xa0   :  { %v267_v19 = vsel %vm262_vm7, %v251_v3, %v253_v55  ;;  %v43_v55 = vsub.s32 1, %v38_v51 }
  0xa1   :  { %351 = vmatpush1.msra.mxu0 %v267_v19  ;;  %v189_v39 = vsel %vm187_vm4, %v1384_v2, %v1385_v62  ;;  %v190_v36 = vsel %vm187_vm4, %v1350_v47, %v1384_v2  ;;  %v1238_v47 = vpack.c.bf16 %v158_v6, %v133_v9 }
  0xa2   :  { %1233 = vmatprep.subr.bf16.mxu0 %v1232_v5  ;;  %v1388_v38 = vpop.permute.xlu1 %1387  ;;  %1194 = vmatmul.mubr.msk.f32.vlgmr.msra.gmra.mrb[0].mxu0 %vm330_vm8, %v1795_v4  ;;  %v1224_v17 = vpack.c.bf16 %v189_v39, %v1595_v7  ;;  %v1226_v22 = vpack.c.bf16 %v190_v36, %v1556_v0 }
  0xa3   :  { %v186_v24 = vpop.permute.xlu0 %185  ;;  %1235 = vmatpush1.bf16.msra.mxu0 %v1234_v18  ;;  %540 = vmatprep.mubr.f32.mxu0 %v1505_v10  ;;  %v1390_v25 = vunpack.i.h.bf16 %v1388_v38  ;;  %v1389_v27 = vunpack.i.l.bf16 %v1388_v38 }
  0xa4   :  { %v193_v45 = vsel %vm187_vm4, %v186_v24, %v1698_v43  ;;  %1237 = vmatprep.subr.bf16.mxu0 %v1236_v41  ;;  %1225 = vmatprep.subr.bf16.mxu1 %v1224_v17  ;;  %v188_v7 = vsel %vm187_vm4, %v1385_v62, %v186_v24  ;;  %v51_v62 = vsub.s32 3, %v38_v51 }
  0xa5   :  { %v1240_v26 = vpack.c.bf16 %v193_v45, %v1561_v1  ;;  %1227 = vmatpush1.bf16.msra.mxu1 %v1226_v22  ;;  %v214_v34 = vsel %vm212_vm6, %v1389_v27, %v1390_v25  ;;  %v1242_v43 = vpack.c.bf16 %v188_v7, %v1600_v8  ;;  %v215_v37 = vsel %vm212_vm6, %v1355_v57, %v1389_v27  ;;  %v547_v45 = vld [vmem:[%s2251_s3] sm:$0xff] }
  0xa6   :  { %v211_v0 = vpop.permute.xlu1 %210 }
  0xa7   :  { %v1393_v29 = vpop.permute.xlu0 %1392  ;;  %1239 = vmatpush1.bf16.msra.mxu0 %v1238_v47  ;;  %v213_v8 = vsel %vm212_vm6, %v1390_v25, %v211_v0  ;;  %v218_v20 = vsel %vm212_vm6, %v211_v0, %v1741_v63  ;;  %v1507_v25 = vmov 0  }
  0xa8   :  { %v1395_v31 = vunpack.i.h.bf16 %v1393_v29  ;;  %v1394_v32 = vunpack.i.l.bf16 %v1393_v29  ;;  %1241 = vmatprep.subr.bf16.mxu0 %v1240_v26  ;;  %1396 = vset.pattern.permute.xlu0 %v1507_v25 }
  0xa9   :  { %1397 = vset.pattern.permute.xlu1 %v1507_v25 }
  0xaa   :  { %v257_v35 = vpop.permute.xlu1 %256  ;;  %v239_v1 = vsel %vm237_vm5, %v1394_v32, %v1395_v31  ;;  %v240_v40 = vsel %vm237_vm5, %v1360_v52, %v1394_v32 }
  0xab   :  { %v236_v42 = vpop.permute.xlu0 %235  ;;  %1243 = vmatpush1.bf16.msra.mxu0 %v1242_v43  ;;  %v1228_v44 = vpack.c.bf16 %v239_v1, %v214_v34  ;;  %v1230_v46 = vpack.c.bf16 %v240_v40, %v215_v37 }
  0xac   :  { %v238_v54 = vsel %vm237_vm5, %v1395_v31, %v236_v42  ;;  %v243_v49 = vsel %vm237_vm5, %v236_v42, %v1732_v60  ;;  %v265_v60 = vsel %vm262_vm7, %v1773_v16, %v257_v35  ;;  %v35_v16 = vld [vmem:[%s2250_s1] sm:$0x3f] }
  0xad   :  { %v1244_v57 = vpack.c.bf16 %v243_v49, %v218_v20  ;;  %v1246_v52 = vpack.c.bf16 %v238_v54, %v213_v8  ;;  %1229 = vmatprep.subr.bf16.mxu1 %v1228_v44  ;;  %v1870_v56 = vrot.slane %v35_v16, %v39_v53  ;;  %v1872_v30 = vrot.slane %v35_v16, %v43_v55 }
  0xae   :  { %1231 = vmatpush1.bf16.msra.mxu1 %v1230_v46  ;;  %v261_v21 = vpop.permute.xlu1 %260  ;;  %v1876_v2 = vrot.slane %v35_v16, %v47_v61  ;;  %v1885_v36 = vrot.slane %v35_v16, %v59_v12 }
  0xaf   :  { %v259_v48 = vpop.permute.xlu0 %258  ;;  %1245 = vmatprep.subr.bf16.mxu0 %v1244_v57  ;;  %v268_v13 = vsel %vm262_vm7, %v261_v21, %v251_v3  ;;  %v1878_v3 = vrot.slane %v35_v16, %v51_v62 }
  0xb0   :  { %1247 = vmatpush1.bf16.msra.mxu0 %v1246_v52  ;;  %v264_v63 = vsel %vm262_vm7, %v257_v35, %v259_v48  ;;  %v263_v50 = vsel %vm262_vm7, %v259_v48, %v261_v21 }
  0xb1   :  { %421 = vmatprep.subr.mxu1 %v264_v63  ;;  %492 = vmatprep.subr.mxu0 %v268_v13  ;;  %v548_v13 = vld [vmem:[%s2252_s4] sm:$0xff] }
  0xb2   :  { %422 = vmatpush1.msra.mxu1 %v265_v60 }
  0xb3   :  { %1195 = vmatmul.mubr.msk.f32.vlgmr.msra.gmra.mrb[0].mxu1 %vm330_vm8, %v1795_v4 }
  0xb4   :  { %493 = vmatpush1.msra.mxu0 %v263_v50  ;;  %951 = vmatprep.mubr.f32.mxu1 %v1505_v10 }
  0xb5   :  { %1196 = vmatmul.mubr.msk.f32.vlgmr.msra.gmra.mrb[2].mxu0 %vm330_vm8, %v1795_v4  ;;  %v1880_v4 = vrot.slane %v35_v16, %v55_v11 }
  0xb6   :  { %1022 = vmatprep.mubr.f32.mxu0 %v1505_v10 }
 0x175   :  { %v400_v23 = vpop.f32.mrb[0].mxu0 }
 0x176   :  { %v549_v33 = vmul.f32 %v400_v23, %v1870_v56  ;;  %v402_v28 = vpop.f32.mrb[1].mxu0 }
 0x177   :  { %v550_v58 = vmul.f32 %v402_v28, %v1872_v30 }
 0x179   :  { %v555_v59 = vadd.f32 %v550_v58, %v549_v33 }
 0x186   :  { %v471_v15 = vpop.f32.mrb[0].mxu1 }
 0x187   :  { %v551_v18 = vmul.f32 %v471_v15, %v1876_v2  ;;  %v473_v19 = vpop.f32.mrb[1].mxu1 }
 0x188   :  { %v552_v5 = vmul.f32 %v473_v19, %v1878_v3  ;;  %v542_v6 = vpop.f32.mrb[2].mxu0 }
 0x189   :  { %v556_v9 = vadd.f32 %v555_v59, %v551_v18  ;;  %v553_v39 = vmul.f32 %v542_v6, %v1880_v4  ;;  %v544_v38 = vpop.f32.mrb[3].mxu0 }
 0x18a   :  { %v554_v17 = vmul.f32 %v544_v38, %v1885_v36 }
 0x18b   :  { %v557_v41 = vadd.f32 %v556_v9, %v552_v5 }
 0x18d   :  { %v558_v22 = vadd.f32 %v557_v41, %v553_v39 }
 0x18f   :  { %v559_v24 = vadd.f32 %v558_v22, %v554_v17 }
 0x191   :  { %560 = vadd.xlane.f32.xlu0 %v559_v24 }
 0x1a7   :  { %599 = vperm.xlu0 %1396, %v547_v45  }
 0x21e   :  { %v561_v47 = vpop.xlane.xlu0 %560 }
 0x21f   :  { %v562_v26 = vmul.f32 0.001953125, %v561_v47 }
 0x221   :  { %v563_v27 = vsub.f32 %v400_v23, %v562_v26  ;;  %v564_v7 = vsub.f32 %v402_v28, %v562_v26  ;;  %v565_v0 = vsub.f32 %v471_v15, %v562_v26  ;;  %v566_v29 = vsub.f32 %v473_v19, %v562_v26 }
 0x222   :  { %v567_v31 = vsub.f32 %v542_v6, %v562_v26  ;;  %v568_v35 = vsub.f32 %v544_v38, %v562_v26 }
 0x223   :  { %v569_v32 = vmul.f32 %v563_v27, %v1870_v56  ;;  %v570_v34 = vmul.f32 %v564_v7, %v1872_v30  ;;  %v571_v43 = vmul.f32 %v565_v0, %v1876_v2  ;;  %v572_v1 = vmul.f32 %v566_v29, %v1878_v3 }
 0x224   :  { %v573_v42 = vmul.f32 %v567_v31, %v1880_v4  ;;  %v574_v8 = vmul.f32 %v568_v35, %v1885_v36 }
 0x225   :  { %v575_v37 = vmul.f32 %v569_v32, %v569_v32  ;;  %v576_v40 = vmul.f32 %v570_v34, %v570_v34  ;;  %v577_v44 = vmul.f32 %v571_v43, %v571_v43  ;;  %v578_v20 = vmul.f32 %v572_v1, %v572_v1 }
 0x226   :  { %v579_v49 = vmul.f32 %v573_v42, %v573_v42  ;;  %v580_v52 = vmul.f32 %v574_v8, %v574_v8  ;;  %v600_v53 = vpop.permute.xlu0 %599 }
 0x227   :  { %v581_v46 = vadd.f32 %v576_v40, %v575_v37 }
 0x229   :  { %v582_v54 = vadd.f32 %v581_v46, %v577_v44 }
 0x22b   :  { %v583_v57 = vadd.f32 %v582_v54, %v578_v20 }
 0x22d   :  { %v584_v21 = vadd.f32 %v583_v57, %v579_v49 }
 0x22f   :  { %v585_v48 = vadd.f32 %v584_v21, %v580_v52 }
 0x231   :  { %586 = vadd.xlane.f32.xlu1 %v585_v48 }
 0x242   :  { %610 = vperm.xlu1 %1397, %v548_v13  }
 0x2be   :  { %v587_v63 = vpop.xlane.xlu1 %586 }
 0x2bf   :  { %v588_v60 = vmul.f32 0.001953125, %v587_v63 }
 0x2c1   :  { %v589_v50 = vadd.f32 1e-05, %v588_v60 }
 0x2c2   :  { %v611_v28 = vpop.permute.xlu1 %610 }
 0x2c3   :  { %1488 = vrsqrt.f32 %v589_v50 }
 0x2cd   :  { %v1489_v51 = vpop.eup %1488 }
 0x2ce   :  { %v591_v16 = vmul.f32 %v1489_v51, %v563_v27  ;;  %v592_v55 = vmul.f32 %v1489_v51, %v564_v7  ;;  %v593_v23 = vmul.f32 %v1489_v51, %v565_v0  ;;  %v596_v33 = vmul.f32 %v1489_v51, %v568_v35 }
 0x2cf   :  { %v594_v9 = vmul.f32 %v1489_v51, %v566_v29  ;;  %v595_v39 = vmul.f32 %v1489_v51, %v567_v31 }
 0x2d0   :  { %v602_v58 = vmul.f32 %v600_v53, %v591_v16  ;;  %v603_v59 = vmul.f32 %v600_v53, %v592_v55  ;;  %v604_v61 = vmul.f32 %v600_v53, %v593_v23  ;;  %v607_v62 = vmul.f32 %v600_v53, %v596_v33 }
 0x2d1   :  { %v605_v45 = vmul.f32 %v600_v53, %v594_v9  ;;  %v606_v47 = vmul.f32 %v600_v53, %v595_v39 }
 0x2d2   :  { %v613_v11 = vadd.f32 %v611_v28, %v602_v58  ;;  %v614_v12 = vadd.f32 %v611_v28, %v603_v59  ;;  %v615_v15 = vadd.f32 %v611_v28, %v604_v61  ;;  %v618_v18 = vadd.f32 %v611_v28, %v607_v62 }
 0x2d3   :  { %v616_v27 = vadd.f32 %v611_v28, %v605_v45  ;;  %v617_v7 = vadd.f32 %v611_v28, %v606_v47 }
 0x2d4   :  { %v619_v19 = vmax.f32 %v613_v11, 0.0  ;;  %v620_v5 = vmax.f32 %v614_v12, 0.0  ;;  %v621_v6 = vmax.f32 %v615_v15, 0.0  ;;  %v624_v38 = vmax.f32 %v618_v18, 0.0 }
 0x2d5   :  { %v622_v29 = vmax.f32 %v616_v27, 0.0  ;;  %v623_v31 = vmax.f32 %v617_v7, 0.0 }
 0x2d6   :  { %v1901_v41 = vmul.f32 %v619_v19, %v1870_v56  ;;  %v1904_v17 = vmul.f32 %v620_v5, %v1872_v30  ;;  %v1907_v22 = vmul.f32 %v621_v6, %v1876_v2  ;;  %v1910_v24 = vmul.f32 %v624_v38, %v1885_v36 }
 0x2d7   :  { %v1925_v32 = vmul.f32 %v622_v29, %v1878_v3  ;;  %v1928_v34 = vmul.f32 %v623_v31, %v1880_v4 }
 0x2d8   :  { %v1398_v25 = vpack.i.bf16 %v1904_v17, %v1901_v41  ;;  %v1428_v26 = vpack.i.bf16 %v1907_v22, %v1910_v24  ;;  %v1438_v0 = vpack.i.bf16 %v1907_v22, %v1904_v17 }
 0x2d9   :  { %v1453_v43 = vpack.i.bf16 %v1928_v34, %v1925_v32 }
 0x2da   :  { %1399 = vrot.lane.b32.xlu1 %v1398_v25, %s1498_s13  ;;  %1429 = vrot.lane.b32.xlu0 %v1428_v26, %s1501_s16 }
 0x2de   :  { %1404 = vrot.lane.b32.xlu1 %v1398_v25, %s1499_s14  ;;  %1439 = vrot.lane.b32.xlu0 %v1438_v0, %s1502_s17 }
 0x2e2   :  { %1409 = vrot.lane.b32.xlu1 %v1428_v26, %s1498_s13  ;;  %1444 = vrot.lane.b32.xlu0 %v1438_v0, %s1504_s19 }
 0x2e6   :  { %1414 = vrot.lane.b32.xlu1 %v1428_v26, %s1499_s14  ;;  %757 = vrot.lane.b32.xlu0 %v1901_v41, %s1504_s19 }
 0x2ea   :  { %1419 = vrot.lane.b32.xlu1 %v1398_v25, %s1501_s16  ;;  %1454 = vrot.lane.b32.xlu0 %v1453_v43, %s1498_s13 }
 0x2ee   :  { %1424 = vrot.lane.b32.xlu1 %v1398_v25, %s1500_s15  ;;  %1464 = vrot.lane.b32.xlu0 %v1453_v43, %s1501_s16 }
 0x2f2   :  { %1434 = vrot.lane.b32.xlu1 %v1428_v26, %s1500_s15  ;;  %807 = vrot.lane.b32.xlu0 %v1904_v17, %s1506_s24 }
 0x2f6   :  { %733 = vrot.lane.b32.xlu1 %v1901_v41, %s1502_s17  ;;  %805 = vrot.lane.b32.xlu0 %v1901_v41, %s1506_s24 }
 0x2fa   :  { %1449 = vrot.lane.b32.xlu1 %v1438_v0, %s1503_s18  ;;  %743 = vrot.lane.b32.xlu0 %v1910_v24, %s1502_s17 }
 0x2fe   :  { %781 = vrot.lane.b32.xlu1 %v1901_v41, %s1503_s18  ;;  %1484 = vrot.lane.b32.xlu0 %v1453_v43, %s1503_s18 }
 0x302   :  { %1459 = vrot.lane.b32.xlu1 %v1453_v43, %s1499_s14  ;;  %791 = vrot.lane.b32.xlu0 %v1910_v24, %s1503_s18 }
 0x306   :  { %1469 = vrot.lane.b32.xlu1 %v1453_v43, %s1500_s15  ;;  %813 = vrot.lane.b32.xlu0 %v1928_v34, %s1506_s24 }
 0x30a   :  { %809 = vrot.lane.b32.xlu1 %v1907_v22, %s1506_s24 }
 0x30e   :  { %1474 = vrot.lane.b32.xlu1 %v1453_v43, %s1502_s17 }
 0x312   :  { %1479 = vrot.lane.b32.xlu1 %v1453_v43, %s1504_s19 }
 0x316   :  { %767 = vrot.lane.b32.xlu1 %v1910_v24, %s1504_s19 }
 0x31a   :  { %811 = vrot.lane.b32.xlu1 %v1925_v32, %s1506_s24 }
 0x31e   :  { %815 = vrot.lane.b32.xlu1 %v1910_v24, %s1506_s24 }
 0x34c   :  { %v1968_v35 = vpop.permute.xlu1 %1399  ;;  %v1970_v1 = vpop.permute.xlu0 %1429 }
 0x34d   :  { %v1402_v37 = vunpack.i.h.bf16 %v1968_v35  ;;  %v1401_v40 = vunpack.i.l.bf16 %v1968_v35  ;;  %v1431_v18 = vunpack.i.l.bf16 %v1970_v1 }
 0x34f   :  { %v647_v20 = vsel %vm81_vm0, %v1401_v40, %v1402_v37 }
 0x350   :  { %v1974_v42 = vpop.permute.xlu1 %1404  ;;  %v1976_v44 = vpop.permute.xlu0 %1439 }
 0x351   :  { %v1407_v46 = vunpack.i.h.bf16 %v1974_v42  ;;  %v1406_v8 = vunpack.i.l.bf16 %v1974_v42  ;;  %v1442_v59 = vunpack.i.h.bf16 %v1976_v44  ;;  %v1441_v61 = vunpack.i.l.bf16 %v1976_v44 }
 0x353   :  { %v671_v54 = vsel %vm106_vm1, %v1406_v8, %v1407_v46  ;;  %v748_v5 = vsel %vm187_vm4, %v1441_v61, %v1442_v59 }
 0x354   :  { %v1988_v49 = vpop.permute.xlu1 %1409  ;;  %v1248_v57 = vpack.c.bf16 %v671_v54, %v647_v20  ;;  %v1990_v52 = vpop.permute.xlu0 %1444  ;;  %v1256_v47 = vpack.c.bf16 %v748_v5, %v1904_v17 }
 0x355   :  { %v1411_v21 = vunpack.i.l.bf16 %v1988_v49  ;;  %v1447_v26 = vunpack.i.h.bf16 %v1990_v52  ;;  %v1446_v27 = vunpack.i.l.bf16 %v1990_v52 }
 0x356   :  { %1249 = vmatprep.subr.bf16.mxu1 %v1248_v57 }
 0x357   :  { %v648_v63 = vsel %vm81_vm0, %v1411_v21, %v1401_v40  ;;  %v772_v17 = vsel %vm212_vm6, %v1446_v27, %v1447_v26 }
 0x358   :  { %v1993_v48 = vpop.permute.xlu1 %1414  ;;  %v2000_v60 = vpop.permute.xlu0 %757 }
 0x359   :  { %v1416_v13 = vunpack.i.l.bf16 %v1993_v48  ;;  %v773_v20 = vsel %vm212_vm6, %v2000_v60, %v1446_v27  ;;  %v1417_v57 = vunpack.i.h.bf16 %v1993_v48 }
 0x35b   :  { %v672_v50 = vsel %vm106_vm1, %v1416_v13, %v1406_v8 }
 0x35c   :  { %v1250_v51 = vpack.c.bf16 %v672_v50, %v648_v63  ;;  %v2006_v53 = vpop.permute.xlu1 %1419  ;;  %v2012_v33 = vpop.permute.xlu0 %1454 }
 0x35d   :  { %v1422_v16 = vunpack.i.h.bf16 %v2006_v53  ;;  %v1421_v55 = vunpack.i.l.bf16 %v2006_v53  ;;  %v1456_v50 = vunpack.i.l.bf16 %v2012_v33 }
 0x35e   :  { %1251 = vmatpush1.bf16.msra.mxu1 %v1250_v51 }
 0x35f   :  { %v695_v62 = vsel %vm131_vm2, %v1421_v55, %v1422_v16  ;;  %v696_v6 = vsel %vm131_vm2, %v1431_v18, %v1421_v55  ;;  %v1412_v55 = vunpack.i.h.bf16 %v1988_v49 }
 0x360   :  { %v2010_v23 = vpop.permute.xlu1 %1424  ;;  %v2036_v9 = vpop.permute.xlu0 %1464 }
 0x361   :  { %v1427_v28 = vunpack.i.h.bf16 %v2010_v23  ;;  %v1426_v58 = vunpack.i.l.bf16 %v2010_v23  ;;  %v645_v5 = vsel %vm81_vm0, %v1412_v55, %v1456_v50  ;;  %v646_v42 = vsel %vm81_vm0, %v1402_v37, %v1412_v55 }
 0x363   :  { %v719_v11 = vsel %vm156_vm3, %v1426_v58, %v1427_v28 }
 0x364   :  { %v2024_v12 = vpop.permute.xlu1 %1434  ;;  %v1252_v15 = vpack.c.bf16 %v719_v11, %v695_v62  ;;  %v808_v29 = vpop.permute.xlu0 %807  ;;  %v1466_v11 = vunpack.i.l.bf16 %v2036_v9 }
 0x365   :  { %v1436_v19 = vunpack.i.l.bf16 %v2024_v12  ;;  %v1437_v62 = vunpack.i.h.bf16 %v2024_v12 }
 0x366   :  { %1253 = vmatprep.subr.bf16.mxu1 %v1252_v15 }
 0x367   :  { %v720_v39 = vsel %vm156_vm3, %v1436_v19, %v1426_v58 }
 0x368   :  { %v1254_v38 = vpack.c.bf16 %v720_v39, %v696_v6  ;;  %v2042_v25 = vpop.permute.xlu1 %733  ;;  %v2073_v51 = vpop.permute.xlu0 %805  ;;  %v1432_v39 = vunpack.i.h.bf16 %v1970_v1 }
 0x369   :  { %v749_v45 = vsel %vm187_vm4, %v2042_v25, %v1441_v61  ;;  %v670_v61 = vsel %vm106_vm1, %v1407_v46, %v1417_v57  ;;  %v821_v49 = vsel %vm262_vm7, %v2073_v51, %v808_v29 }
 0x36a   :  { %1255 = vmatpush1.bf16.msra.mxu1 %v1254_v38  ;;  %v1258_v7 = vpack.c.bf16 %v749_v45, %v1901_v41  ;;  %v1266_v45 = vpack.c.bf16 %v670_v61, %v646_v42  ;;  %v693_v35 = vsel %vm131_vm2, %v1432_v39, %v1466_v11 }
 0x36b   :  { %1257 = vmatprep.subr.bf16.mxu1 %v1256_v47  ;;  %v1457_v47 = vunpack.i.h.bf16 %v2012_v33 }
 0x36c   :  { %v2051_v0 = vpop.permute.xlu1 %1449  ;;  %v744_v27 = vpop.permute.xlu0 %743 }
 0x36d   :  { %v1452_v31 = vunpack.i.h.bf16 %v2051_v0  ;;  %v1451_v43 = vunpack.i.l.bf16 %v2051_v0  ;;  %v643_v48 = vsel %vm81_vm0, %v1457_v47, %v1411_v21 }
 0x36e   :  { %1259 = vmatpush1.bf16.msra.mxu1 %v1258_v7 }
 0x36f   :  { %v796_v40 = vsel %vm237_vm5, %v1451_v43, %v1452_v31 }
 0x370   :  { %v2063_v8 = vpop.permute.xlu1 %781  ;;  %v1260_v41 = vpack.c.bf16 %v796_v40, %v772_v17  ;;  %v718_v17 = vsel %vm156_vm3, %v1427_v28, %v1437_v62  ;;  %v1467_v40 = vunpack.i.h.bf16 %v2036_v9  ;;  %v694_v28 = vsel %vm131_vm2, %v1422_v16, %v1432_v39 }
 0x371   :  { %v797_v54 = vsel %vm237_vm5, %v2063_v8, %v1451_v43  ;;  %v644_v16 = vsel %vm81_vm0, %v1456_v50, %v1457_v47 }
 0x372   :  { %v1262_v63 = vpack.c.bf16 %v797_v54, %v773_v20  ;;  %1261 = vmatprep.subr.bf16.mxu1 %v1260_v41  ;;  %v1270_v54 = vpack.c.bf16 %v718_v17, %v694_v28  ;;  %v691_v12 = vsel %vm131_vm2, %v1467_v40, %v1431_v18  ;;  %v692_v1 = vsel %vm131_vm2, %v1466_v11, %v1467_v40 }
 0x374   :  { %v1460_v23 = vpop.permute.xlu1 %1459  ;;  %1263 = vmatpush1.bf16.msra.mxu1 %v1262_v63  ;;  %v1485_v63 = vpop.permute.xlu0 %1484 }
 0x375   :  { %v1461_v58 = vunpack.i.l.bf16 %v1460_v23  ;;  %v1462_v15 = vunpack.i.h.bf16 %v1460_v23  ;;  %v750_v23 = vsel %vm187_vm4, %v744_v27, %v2042_v25  ;;  %v1486_v18 = vunpack.i.l.bf16 %v1485_v63 }
 0x377   :  { %v669_v6 = vsel %vm106_vm1, %v1417_v57, %v1461_v58  ;;  %v667_v33 = vsel %vm106_vm1, %v1462_v15, %v1416_v13  ;;  %v668_v9 = vsel %vm106_vm1, %v1461_v58, %v1462_v15  ;;  %v2121_v13 = vld [vmem:[%s2253_s5] sm:$0xff]  ;;  %v795_v44 = vsel %vm237_vm5, %v1452_v31, %v1486_v18 }
 0x378   :  { %v1470_v38 = vpop.permute.xlu1 %1469  ;;  %v1264_v46 = vpack.c.bf16 %v669_v6, %v645_v5  ;;  %v1280_v21 = vpack.c.bf16 %v667_v33, %v643_v48  ;;  %v1282_v55 = vpack.c.bf16 %v668_v9, %v644_v16  ;;  %v1288_v6 = vpack.c.bf16 %v750_v23, %v1910_v24 }
 0x379   :  { %v1472_v7 = vunpack.i.h.bf16 %v1470_v38  ;;  %v1471_v43 = vunpack.i.l.bf16 %v1470_v38 }
 0x37a   :  { %1265 = vmatprep.subr.bf16.mxu0 %v1264_v46 }
 0x37b   :  { %1267 = vmatpush1.bf16.msra.mxu0 %v1266_v45  ;;  %v717_v37 = vsel %vm156_vm3, %v1437_v62, %v1471_v43  ;;  %v715_v53 = vsel %vm156_vm3, %v1472_v7, %v1436_v19  ;;  %v716_v19 = vsel %vm156_vm3, %v1471_v43, %v1472_v7  ;;  %v1487_v62 = vunpack.i.h.bf16 %v1485_v63 }
 0x37c   :  { %v2109_v41 = vpop.permute.xlu1 %809  ;;  %v1268_v20 = vpack.c.bf16 %v717_v37, %v693_v35  ;;  %v1286_v15 = vpack.c.bf16 %v716_v19, %v692_v1  ;;  %v1100_v19 = vld [vmem:[%s2254_s6] sm:$0xff] }
 0x37d   :  { %v820_v57 = vsel %vm262_vm7, %v808_v29, %v2109_v41  ;;  %v1284_v29 = vpack.c.bf16 %v715_v53, %v691_v12  ;;  %v794_v0 = vsel %vm237_vm5, %v1486_v18, %v1487_v62 }
 0x37e   :  { %903 = vmatprep.subr.mxu1 %v820_v57  ;;  %1269 = vmatprep.subr.bf16.mxu0 %v1268_v20 }
 0x37f   :  { %904 = vmatpush1.msra.mxu1 %v821_v49  ;;  %1271 = vmatpush1.bf16.msra.mxu0 %v1270_v54 }
 0x380   :  { %v1475_v50 = vpop.permute.xlu1 %1474  ;;  %1281 = vmatprep.subr.bf16.mxu1 %v1280_v21  ;;  %1197 = vmatmul.mubr.msk.f32.vlgmr.msra.gmra.mrb[2].mxu1 %vm330_vm8, %v2121_v13 }
 0x381   :  { %v1477_v58 = vunpack.i.h.bf16 %v1475_v50  ;;  %v1476_v61 = vunpack.i.l.bf16 %v1475_v50  ;;  %1283 = vmatpush1.bf16.msra.mxu1 %v1282_v55  ;;  %1093 = vmatprep.mubr.f32.mxu1 %v1505_v10 }
 0x382   :  { %1285 = vmatprep.subr.bf16.mxu1 %v1284_v29 }
 0x383   :  { %v747_v5 = vsel %vm187_vm4, %v1442_v59, %v1476_v61  ;;  %v746_v25 = vsel %vm187_vm4, %v1476_v61, %v1477_v58  ;;  %v745_v10 = vsel %vm187_vm4, %v1477_v58, %v744_v27  ;;  %v792_v59 = vpop.permute.xlu0 %791 }
 0x384   :  { %v1274_v39 = vpack.c.bf16 %v747_v5, %v1907_v22  ;;  %v1480_v11 = vpop.permute.xlu1 %1479  ;;  %v1272_v42 = vpack.c.bf16 %v746_v25, %v1925_v32  ;;  %v1290_v24 = vpack.c.bf16 %v745_v10, %v1928_v34  ;;  %v793_v27 = vsel %vm237_vm5, %v1487_v62, %v792_v59 }
 0x385   :  { %v1482_v38 = vunpack.i.h.bf16 %v1480_v11  ;;  %v1481_v46 = vunpack.i.l.bf16 %v1480_v11  ;;  %1287 = vmatpush1.bf16.msra.mxu1 %v1286_v15  ;;  %v798_v34 = vsel %vm237_vm5, %v792_v59, %v2063_v8 }
 0x386   :  { %1273 = vmatprep.subr.bf16.mxu0 %v1272_v42  ;;  %1289 = vmatprep.subr.bf16.mxu1 %v1288_v6 }
 0x387   :  { %v771_v22 = vsel %vm212_vm6, %v1447_v26, %v1481_v46  ;;  %1275 = vmatpush1.bf16.msra.mxu0 %v1274_v39  ;;  %v770_v32 = vsel %vm212_vm6, %v1481_v46, %v1482_v38  ;;  %v814_v17 = vpop.permute.xlu0 %813 }
 0x388   :  { %v1278_v45 = vpack.c.bf16 %v795_v44, %v771_v22  ;;  %v768_v47 = vpop.permute.xlu1 %767  ;;  %v1276_v31 = vpack.c.bf16 %v794_v0, %v770_v32 }
 0x389   :  { %v769_v52 = vsel %vm212_vm6, %v1482_v38, %v768_v47  ;;  %v774_v26 = vsel %vm212_vm6, %v768_v47, %v2000_v60  ;;  %1291 = vmatpush1.bf16.msra.mxu1 %v1290_v24 }
 0x38a   :  { %v1292_v7 = vpack.c.bf16 %v798_v34, %v774_v26  ;;  %v1294_v43 = vpack.c.bf16 %v793_v27, %v769_v52  ;;  %1277 = vmatprep.subr.bf16.mxu0 %v1276_v31 }
 0x38b   :  { %1279 = vmatpush1.bf16.msra.mxu0 %v1278_v45 }
 0x38c   :  { %v812_v40 = vpop.permute.xlu1 %811  ;;  %1293 = vmatprep.subr.bf16.mxu1 %v1292_v7 }
 0x38d   :  { %v819_v35 = vsel %vm262_vm7, %v2109_v41, %v812_v40  ;;  %1295 = vmatpush1.bf16.msra.mxu1 %v1294_v43  ;;  %v818_v8 = vsel %vm262_vm7, %v812_v40, %v814_v17 }
 0x38e   :  { %974 = vmatprep.subr.mxu0 %v818_v8 }
 0x38f   :  { %975 = vmatpush1.msra.mxu0 %v819_v35 }
 0x390   :  { %v816_v37 = vpop.permute.xlu1 %815  ;;  %1198 = vmatmul.mubr.msk.f32.vlgmr.msra.gmra.mrb[4].mxu0 %vm330_vm8, %v2121_v13 }
 0x391   :  { %v817_v60 = vsel %vm262_vm7, %v814_v17, %v816_v37  ;;  %v822_v33 = vsel %vm262_vm7, %v816_v37, %v2073_v51 }
 0x392   :  { %1045 = vmatprep.subr.mxu1 %v822_v33 }
 0x393   :  { %1046 = vmatpush1.msra.mxu1 %v817_v60 }
 0x394   :  { %1199 = vmatmul.mubr.msk.f32.vlgmr.msra.gmra.mrb[4].mxu1 %vm330_vm8, %v2121_v13 }
 0x453   :  { %v953_v28 = vpop.f32.mrb[2].mxu1 }
 0x454   :  { %v1102_v9 = vmul.f32 %v953_v28, %v1870_v56  ;;  %v955_v41 = vpop.f32.mrb[3].mxu1 }
 0x455   :  { %v1103_v20 = vmul.f32 %v955_v41, %v1872_v30 }
 0x457   :  { %v1108_v54 = vadd.f32 %v1103_v20, %v1102_v9 }
 0x463   :  { %v1024_v57 = vpop.f32.mrb[4].mxu0 }
 0x464   :  { %v1104_v48 = vmul.f32 %v1024_v57, %v1876_v2  ;;  %v1026_v53 = vpop.f32.mrb[5].mxu0 }
 0x465   :  { %v1105_v16 = vmul.f32 %v1026_v53, %v1878_v3 }
 0x466   :  { %v1109_v14 = vadd.f32 %v1108_v54, %v1104_v48  ;;  %v1492_v54 = vld [vmem:[%s2248_s0] sm:$0xff]  ;;  %v1493_v48 = vld [vmem:[%s2248_s0 + $0x8] sm:$0xff] }
 0x467   :  { %v1095_v51 = vpop.f32.mrb[4].mxu1 }
 0x468   :  { %v1110_v49 = vadd.f32 %v1109_v14, %v1105_v16  ;;  %v1106_v21 = vmul.f32 %v1095_v51, %v1880_v4  ;;  %v1097_v63 = vpop.f32.mrb[5].mxu1  ;;  %v1494_v16 = vld [vmem:[%s2248_s0 + $0x10] sm:$0xff] }
 0x469   :  { %v1107_v13 = vmul.f32 %v1097_v63, %v1885_v36 }
 0x46a   :  { %v1111_v55 = vadd.f32 %v1110_v49, %v1106_v21  ;;  %v1496_v21 = vld [vmem:[%s2248_s0 + $0x20] sm:$0xff] }
 0x46c   :  { %v1112_v12 = vadd.f32 %v1111_v55, %v1107_v13  ;;  %v1497_v13 = vld [vmem:[%s2248_s0 + $0x28] sm:$0xff] }
 0x46e   :  { %1113 = vadd.xlane.f32.xlu0 %v1112_v12 }
 0x484   :  { %1152 = vperm.xlu0 %1396, %v1100_v19  }
 0x4fb   :  { %v1114_v50 = vpop.xlane.xlu0 %1113 }
 0x4fc   :  { %v1115_v29 = vmul.f32 0.001953125, %v1114_v50 }
 0x4fe   :  { %v1116_v23 = vsub.f32 %v953_v28, %v1115_v29  ;;  %v1117_v58 = vsub.f32 %v955_v41, %v1115_v29  ;;  %v1118_v61 = vsub.f32 %v1024_v57, %v1115_v29  ;;  %v1119_v1 = vsub.f32 %v1026_v53, %v1115_v29 }
 0x4ff   :  { %v1120_v18 = vsub.f32 %v1095_v51, %v1115_v29  ;;  %v1121_v25 = vsub.f32 %v1097_v63, %v1115_v29  ;;  %v1495_v51 = vld [vmem:[%s2248_s0 + $0x18] sm:$0xff] }
 0x500   :  { %v1122_v62 = vmul.f32 %v1116_v23, %v1870_v56  ;;  %v1123_v15 = vmul.f32 %v1117_v58, %v1872_v30  ;;  %v1124_v5 = vmul.f32 %v1118_v61, %v1876_v2  ;;  %v1125_v6 = vmul.f32 %v1119_v1, %v1878_v3  ;;  %v1101_v2 = vld [vmem:[%s2255_s7] sm:$0xff] }
 0x501   :  { %v1126_v11 = vmul.f32 %v1120_v18, %v1880_v4  ;;  %v1127_v46 = vmul.f32 %v1121_v25, %v1885_v36 }
 0x502   :  { %v1128_v10 = vmul.f32 %v1122_v62, %v1122_v62  ;;  %v1129_v39 = vmul.f32 %v1123_v15, %v1123_v15  ;;  %v1130_v42 = vmul.f32 %v1124_v5, %v1124_v5  ;;  %v1131_v44 = vmul.f32 %v1125_v6, %v1125_v6 }
 0x503   :  { %v1132_v24 = vmul.f32 %v1126_v11, %v1126_v11  ;;  %v1133_v56 = vmul.f32 %v1127_v46, %v1127_v46  ;;  %v1153_v34 = vpop.permute.xlu0 %1152 }
 0x504   :  { %v1134_v38 = vadd.f32 %v1129_v39, %v1128_v10 }
 0x506   :  { %v1135_v59 = vadd.f32 %v1134_v38, %v1130_v42 }
 0x508   :  { %v1136_v22 = vadd.f32 %v1135_v59, %v1131_v44 }
 0x50a   :  { %v1137_v32 = vadd.f32 %v1136_v22, %v1132_v24 }
 0x50c   :  { %v1138_v30 = vadd.f32 %v1137_v32, %v1133_v56 }
 0x50e   :  { %1139 = vadd.xlane.f32.xlu1 %v1138_v30 }
 0x51f   :  { %1163 = vperm.xlu1 %1397, %v1101_v2  }
 0x59b   :  { %v1140_v3 = vpop.xlane.xlu1 %1139 }
 0x59c   :  { %v1141_v0 = vmul.f32 0.001953125, %v1140_v3 }
 0x59e   :  { %v1142_v4 = vadd.f32 1e-05, %v1141_v0 }
 0x59f   :  { %v1164_v35 = vpop.permute.xlu1 %1163 }
 0x5a0   :  { %1490 = vrsqrt.f32 %v1142_v4 }
 0x5aa   :  { %v1491_v45 = vpop.eup %1490 }
 0x5ab   :  { %v1144_v47 = vmul.f32 %v1491_v45, %v1116_v23  ;;  %v1145_v36 = vmul.f32 %v1491_v45, %v1117_v58  ;;  %v1146_v31 = vmul.f32 %v1491_v45, %v1118_v61  ;;  %v1147_v27 = vmul.f32 %v1491_v45, %v1119_v1 }
 0x5ac   :  { %v1148_v52 = vmul.f32 %v1491_v45, %v1120_v18  ;;  %v1149_v26 = vmul.f32 %v1491_v45, %v1121_v25 }
 0x5ad   :  { %v1155_v7 = vmul.f32 %v1153_v34, %v1144_v47  ;;  %v1156_v43 = vmul.f32 %v1153_v34, %v1145_v36  ;;  %v1157_v17 = vmul.f32 %v1153_v34, %v1146_v31  ;;  %v1158_v40 = vmul.f32 %v1153_v34, %v1147_v27 }
 0x5ae   :  { %v1159_v8 = vmul.f32 %v1153_v34, %v1148_v52  ;;  %v1160_v37 = vmul.f32 %v1153_v34, %v1149_v26 }
 0x5af   :  { %v1166_v60 = vadd.f32 %v1164_v35, %v1155_v7  ;;  %v1167_v33 = vadd.f32 %v1164_v35, %v1156_v43  ;;  %v1168_v28 = vadd.f32 %v1164_v35, %v1157_v17  ;;  %v1169_v9 = vadd.f32 %v1164_v35, %v1158_v40 }
 0x5b0   :  { %v1170_v41 = vadd.f32 %v1164_v35, %v1159_v8  ;;  %v1171_v20 = vadd.f32 %v1164_v35, %v1160_v37 }
 0x5b1   :  { %v1172_v57 = vadd.f32 %v1492_v54, %v1166_v60  ;;  %v1173_v53 = vadd.f32 %v1493_v48, %v1167_v33  ;;  %v1174_v14 = vadd.f32 %v1494_v16, %v1168_v28  ;;  %v1175_v49 = vadd.f32 %v1495_v51, %v1169_v9 }
 0x5b2   :  { %v1176_v63 = vadd.f32 %v1496_v21, %v1170_v41  ;;  %v1177_v55 = vadd.f32 %v1497_v13, %v1171_v20 }
 0x5b3   :  { %v1178_v12 = vmax.f32 %v1172_v57, 0.0  ;;  %v1179_v19 = vmax.f32 %v1173_v53, 0.0  ;;  %v1180_v50 = vmax.f32 %v1174_v14, 0.0  ;;  %v1181_v29 = vmax.f32 %v1175_v49, 0.0 }
 0x5b4   :  { %v1182_v23 = vmax.f32 %v1176_v63, 0.0  ;;  %v1183_v58 = vmax.f32 %v1177_v55, 0.0 }
 0x5b5   :  { %1184 = vst [vmem:[%s2256_s8] sm:$0xff] %v1178_v12  ;;  %1185 = vst [vmem:[%s2256_s8 + $0x8] sm:$0xff] %v1179_v19 }
 0x5b6   :  { %1186 = vst [vmem:[%s2256_s8 + $0x10] sm:$0xff] %v1180_v50  ;;  %1187 = vst [vmem:[%s2256_s8 + $0x18] sm:$0xff] %v1181_v29 }
 0x5b7   :  { %1188 = vst [vmem:[%s2256_s8 + $0x20] sm:$0xff] %v1182_v23  ;;  %1189 = vst [vmem:[%s2256_s8 + $0x28] sm:$0xff] %v1183_v58 }

</bundles_post_ra>
